<compile_context>
chip_gen: v5e
topology: v5e:2x2
jax: 0.10.0
libtpu: 0.0.40
codegen_flags: <defaults>
</compile_context>

<pallas_src>
import jax
import jax.numpy as jnp
from jax.experimental import pallas as pl
from jax.experimental.pallas import tpu as pltpu
import numpy as np


def _make_rnn_kernel(seq_len, batch_pad, hidden_size, num_layers):
    """Build a kernel for fixed static sizes / layer count."""

    def kernel(*refs):
        # ref order:
        #   u_ref (S*Bp, I),
        #   [w_ih_l (I_l, H), w_hh_l (H, H), b_l (1, H)] * num_layers,
        #   w_fc (H, O), b_fc (1, O),
        #   out_ref (S*Bp, O)
        u_ref = refs[0]
        idx = 1
        layer_refs = []
        for _ in range(num_layers):
            layer_refs.append((refs[idx], refs[idx + 1], refs[idx + 2]))
            idx += 3
        w_fc_ref = refs[idx]
        b_fc_ref = refs[idx + 1]
        out_ref = refs[idx + 2]

        # Load all weights once; they stay resident in vregs.
        w_ih = [r[0][...] for r in layer_refs]      # (I_l, H)
        w_hh = [r[1][...] for r in layer_refs]      # (H, H)
        bias = [r[2][...] for r in layer_refs]      # (1, H)

        # Hoisted layer-0 input projection + bias for ALL timesteps at once:
        # one dense (S*Bp, I) @ (I, H) matmul.
        pre0 = jnp.dot(u_ref[...], w_ih[0],
                       preferred_element_type=jnp.float32) + bias[0]

        Bp = batch_pad

        # Wavefront schedule over (layer, time): global step k computes
        # layer l at time t = k - l.  Every value computed at step k depends
        # only on step k-1 results, so the serial matmul->tanh chain is
        # S + L - 1 links instead of S * L, and the per-step per-layer
        # chains are independent (LLO can overlap MXU + EUP work).
        # TODO(synk): if S grows much larger, switch to
        # lax.fori_loop(..., unroll=True) with an 8-row-aligned scratch to
        # bound vreg live ranges; at S=8, H=32 register residency is fine.
        h_cur = [None] * num_layers
        last_outs = []
        for k in range(seq_len + num_layers - 1):
            h_prev = list(h_cur)                   # snapshot of step k-1 values
            for l in range(num_layers):
                t = k - l
                if t < 0 or t >= seq_len:
                    continue
                if l == 0:
                    # Aligned full-sublane-group slice (Bp % 8 == 0).
                    inp = pre0[t * Bp:(t + 1) * Bp, :]
                else:
                    # Per-step input projection for upper layers; reads only
                    # step k-1 values, so it is off the critical path.
                    inp = (jnp.dot(h_prev[l - 1], w_ih[l],
                                   preferred_element_type=jnp.float32)
                           + bias[l])
                if t == 0:
                    # Peeled: h0 == 0, so the h @ w_hh term vanishes.
                    h_new = jnp.tanh(inp)
                else:
                    h_new = jnp.tanh(
                        inp + jnp.dot(h_prev[l], w_hh[l],
                                      preferred_element_type=jnp.float32))
                h_cur[l] = h_new
                if l == num_layers - 1:
                    last_outs.append(h_new)

        # Register-resident last-layer sequence -> one FC matmul, one store.
        x = jnp.concatenate(last_outs, axis=0)      # (S*Bp, H)
        out_ref[...] = (
            jnp.dot(x, w_fc_ref[...], preferred_element_type=jnp.float32)
            + b_fc_ref[...]
        )

    return kernel


def branchnet_rnn_forward(u, params, *, hidden_size, num_layers, out_size):
    """u: (S, B, I) float32.  params: dict of pre-transposed weights."""
    seq_len, batch, input_size = u.shape

    # Pad batch up to a full sublane group (multiple of 8) with zero rows.
    # Rows are independent through the RNN, so padded rows never contaminate
    # real rows; they are sliced off below.
    batch_pad = ((batch + 7) // 8) * 8
    if batch_pad != batch:
        u = jnp.pad(u, ((0, 0), (0, batch_pad - batch), (0, 0)))
    u_flat = u.reshape(seq_len * batch_pad, input_size)

    flat_inputs = [u_flat]
    for l in range(num_layers):
        flat_inputs.extend([params["w_ih"][l], params["w_hh"][l], params["b"][l]])
    flat_inputs.extend([params["w_fc"], params["b_fc"]])

    kernel = _make_rnn_kernel(seq_len, batch_pad, hidden_size, num_layers)

    vmem = pltpu.MemorySpace.VMEM
    out_flat = pl.pallas_call(
        kernel,
        out_shape=jax.ShapeDtypeStruct((seq_len * batch_pad, out_size), jnp.float32),
        in_specs=[pl.BlockSpec(memory_space=vmem) for _ in flat_inputs],
        out_specs=pl.BlockSpec(memory_space=vmem),
    )(*flat_inputs)
    # TODO(synk): for large S/B, add a batch grid ("parallel"; never time --
    # the recurrence is serial), keep weights in unblocked resident specs,
    # and size per-tile buffers against v7x's 64 MiB VMEM via
    # pltpu.CompilerParams(vmem_limit_bytes=...).
    out = out_flat.reshape(seq_len, batch_pad, out_size)
    return out[:, :batch, :]


def init_params(key, input_size, hidden_size, num_layers, out_size):
    """Deterministic init, mirroring PyTorch's U(-1/sqrt(H), 1/sqrt(H))."""
    bound = 1.0 / np.sqrt(hidden_size)
    keys = jax.random.split(key, 4 * num_layers + 2)
    w_ih, w_hh, b = [], [], []
    ki = 0
    for l in range(num_layers):
        in_l = input_size if l == 0 else hidden_size
        # stored pre-transposed: (in_l, H) and (H, H) so kernel does x @ W
        w_ih.append(
            jax.random.uniform(keys[ki], (in_l, hidden_size), jnp.float32, -bound, bound)
        )
        w_hh.append(
            jax.random.uniform(keys[ki + 1], (hidden_size, hidden_size), jnp.float32, -bound, bound)
        )
        b_ih = jax.random.uniform(keys[ki + 2], (hidden_size,), jnp.float32, -bound, bound)
        b_hh = jax.random.uniform(keys[ki + 3], (hidden_size,), jnp.float32, -bound, bound)
        b.append((b_ih + b_hh).reshape(1, hidden_size))
        ki += 4
    w_fc = jax.random.uniform(keys[ki], (hidden_size, out_size), jnp.float32, -bound, bound)
    b_fc = jax.random.uniform(keys[ki + 1], (out_size,), jnp.float32, -bound, bound).reshape(1, out_size)
    return {"w_ih": w_ih, "w_hh": w_hh, "b": b, "w_fc": w_fc, "b_fc": b_fc}


def reference_forward(u, params, *, hidden_size, num_layers):
    """Pure-JAX reference (matches torch nn.RNN(tanh) + Linear, h0=0)."""
    seq_len, batch, _ = u.shape
    x = u
    for l in range(num_layers):
        w_ih, w_hh, b = params["w_ih"][l], params["w_hh"][l], params["b"][l]
        h = jnp.zeros((batch, hidden_size), jnp.float32)
        outs = []
        for t in range(seq_len):
            h = jnp.tanh(x[t] @ w_ih + h @ w_hh + b)
            outs.append(h)
        x = jnp.stack(outs, axis=0)
    return x @ params["w_fc"] + params["b_fc"]


if __name__ == "__main__":
    # small shapes consistent with the module's forward
    SEQ, BATCH = 8, 2
    INPUT_SIZE, HIDDEN_SIZE, NUM_LAYERS, OUT_SIZE = 4, 32, 2, 4

    key = jax.random.PRNGKey(0)
    k_u, k_p = jax.random.split(key)
    u = jax.random.normal(k_u, (SEQ, BATCH, INPUT_SIZE), jnp.float32)
    params = init_params(k_p, INPUT_SIZE, HIDDEN_SIZE, NUM_LAYERS, OUT_SIZE)

    out = branchnet_rnn_forward(
        u, params, hidden_size=HIDDEN_SIZE, num_layers=NUM_LAYERS, out_size=OUT_SIZE
    )
    out = jax.block_until_ready(out)

    ref = reference_forward(u, params, hidden_size=HIDDEN_SIZE, num_layers=NUM_LAYERS)
    assert out.shape == (SEQ, BATCH, OUT_SIZE)
    np.testing.assert_allclose(np.asarray(out), np.asarray(ref), rtol=1e-5, atol=1e-5)

    print("KERNEL_OK")
</pallas_src>

<mosaic_0001>
module attributes {stable_mosaic.version = 11 : i64} {
  func.func @kernel(%arg0: memref<64x4xf32, #tpu.memory_space<vmem>>, %arg1: memref<4x32xf32, #tpu.memory_space<vmem>>, %arg2: memref<32x32xf32, #tpu.memory_space<vmem>>, %arg3: memref<1x32xf32, #tpu.memory_space<vmem>>, %arg4: memref<32x32xf32, #tpu.memory_space<vmem>>, %arg5: memref<32x32xf32, #tpu.memory_space<vmem>>, %arg6: memref<1x32xf32, #tpu.memory_space<vmem>>, %arg7: memref<32x4xf32, #tpu.memory_space<vmem>>, %arg8: memref<1x4xf32, #tpu.memory_space<vmem>>, %arg9: memref<64x4xf32, #tpu.memory_space<vmem>>) attributes {dimension_semantics = [], scalar_prefetch = 0 : i64, scratch_operands = 0 : i64, tpu.core_type = #tpu.core_type<tc>} {
    %c0 = arith.constant 0 : index
    %c0_0 = arith.constant 0 : index
    %0 = vector.load %arg1[%c0, %c0_0] : memref<4x32xf32, #tpu.memory_space<vmem>>, vector<4x32xf32>
    %c0_1 = arith.constant 0 : index
    %c0_2 = arith.constant 0 : index
    %1 = vector.load %arg4[%c0_1, %c0_2] : memref<32x32xf32, #tpu.memory_space<vmem>>, vector<32x32xf32>
    %c0_3 = arith.constant 0 : index
    %c0_4 = arith.constant 0 : index
    %2 = vector.load %arg2[%c0_3, %c0_4] : memref<32x32xf32, #tpu.memory_space<vmem>>, vector<32x32xf32>
    %c0_5 = arith.constant 0 : index
    %c0_6 = arith.constant 0 : index
    %3 = vector.load %arg5[%c0_5, %c0_6] : memref<32x32xf32, #tpu.memory_space<vmem>>, vector<32x32xf32>
    %c0_7 = arith.constant 0 : index
    %c0_8 = arith.constant 0 : index
    %4 = vector.load %arg3[%c0_7, %c0_8] : memref<1x32xf32, #tpu.memory_space<vmem>>, vector<1x32xf32>
    %c0_9 = arith.constant 0 : index
    %c0_10 = arith.constant 0 : index
    %5 = vector.load %arg6[%c0_9, %c0_10] : memref<1x32xf32, #tpu.memory_space<vmem>>, vector<1x32xf32>
    %c0_11 = arith.constant 0 : index
    %c0_12 = arith.constant 0 : index
    %6 = vector.load %arg0[%c0_11, %c0_12] : memref<64x4xf32, #tpu.memory_space<vmem>>, vector<64x4xf32>
    %cst = arith.constant dense<0.000000e+00> : vector<64x32xf32>
    %7 = tpu.matmul %6, %0, %cst {dimension_numbers = #tpu.dot_dimension_numbers<[1], [0], [0], [1], [0, 0, 1, 1], [], []>} : vector<64x4xf32>, vector<4x32xf32>, vector<64x32xf32> -> vector<64x32xf32>
    %8 = vector.broadcast %4 : vector<1x32xf32> to vector<64x32xf32>
    %9 = arith.addf %7, %8 : vector<64x32xf32>
    %10 = vector.extract_strided_slice %9 {offsets = [0, 0], sizes = [8, 32], strides = [1, 1]} : vector<64x32xf32> to vector<8x32xf32>
    %11 = math.tanh %10 : vector<8x32xf32>
    %12 = vector.extract_strided_slice %9 {offsets = [8, 0], sizes = [8, 32], strides = [1, 1]} : vector<64x32xf32> to vector<8x32xf32>
    %cst_13 = arith.constant dense<0.000000e+00> : vector<8x32xf32>
    %13 = tpu.matmul %11, %2, %cst_13 {dimension_numbers = #tpu.dot_dimension_numbers<[1], [0], [0], [1], [0, 0, 1, 1], [], []>} : vector<8x32xf32>, vector<32x32xf32>, vector<8x32xf32> -> vector<8x32xf32>
    %14 = arith.addf %12, %13 : vector<8x32xf32>
    %15 = math.tanh %14 : vector<8x32xf32>
    %cst_14 = arith.constant dense<0.000000e+00> : vector<8x32xf32>
    %16 = tpu.matmul %11, %1, %cst_14 {dimension_numbers = #tpu.dot_dimension_numbers<[1], [0], [0], [1], [0, 0, 1, 1], [], []>} : vector<8x32xf32>, vector<32x32xf32>, vector<8x32xf32> -> vector<8x32xf32>
    %17 = vector.broadcast %5 : vector<1x32xf32> to vector<8x32xf32>
    %18 = arith.addf %16, %17 : vector<8x32xf32>
    %19 = math.tanh %18 : vector<8x32xf32>
    %20 = vector.extract_strided_slice %9 {offsets = [16, 0], sizes = [8, 32], strides = [1, 1]} : vector<64x32xf32> to vector<8x32xf32>
    %cst_15 = arith.constant dense<0.000000e+00> : vector<8x32xf32>
    %21 = tpu.matmul %15, %2, %cst_15 {dimension_numbers = #tpu.dot_dimension_numbers<[1], [0], [0], [1], [0, 0, 1, 1], [], []>} : vector<8x32xf32>, vector<32x32xf32>, vector<8x32xf32> -> vector<8x32xf32>
    %22 = arith.addf %20, %21 : vector<8x32xf32>
    %23 = math.tanh %22 : vector<8x32xf32>
    %cst_16 = arith.constant dense<0.000000e+00> : vector<8x32xf32>
    %24 = tpu.matmul %15, %1, %cst_16 {dimension_numbers = #tpu.dot_dimension_numbers<[1], [0], [0], [1], [0, 0, 1, 1], [], []>} : vector<8x32xf32>, vector<32x32xf32>, vector<8x32xf32> -> vector<8x32xf32>
    %25 = vector.broadcast %5 : vector<1x32xf32> to vector<8x32xf32>
    %26 = arith.addf %24, %25 : vector<8x32xf32>
    %cst_17 = arith.constant dense<0.000000e+00> : vector<8x32xf32>
    %27 = tpu.matmul %19, %3, %cst_17 {dimension_numbers = #tpu.dot_dimension_numbers<[1], [0], [0], [1], [0, 0, 1, 1], [], []>} : vector<8x32xf32>, vector<32x32xf32>, vector<8x32xf32> -> vector<8x32xf32>
    %28 = arith.addf %26, %27 : vector<8x32xf32>
    %29 = math.tanh %28 : vector<8x32xf32>
    %30 = vector.extract_strided_slice %9 {offsets = [24, 0], sizes = [8, 32], strides = [1, 1]} : vector<64x32xf32> to vector<8x32xf32>
    %cst_18 = arith.constant dense<0.000000e+00> : vector<8x32xf32>
    %31 = tpu.matmul %23, %2, %cst_18 {dimension_numbers = #tpu.dot_dimension_numbers<[1], [0], [0], [1], [0, 0, 1, 1], [], []>} : vector<8x32xf32>, vector<32x32xf32>, vector<8x32xf32> -> vector<8x32xf32>
    %32 = arith.addf %30, %31 : vector<8x32xf32>
    %33 = math.tanh %32 : vector<8x32xf32>
    %cst_19 = arith.constant dense<0.000000e+00> : vector<8x32xf32>
    %34 = tpu.matmul %23, %1, %cst_19 {dimension_numbers = #tpu.dot_dimension_numbers<[1], [0], [0], [1], [0, 0, 1, 1], [], []>} : vector<8x32xf32>, vector<32x32xf32>, vector<8x32xf32> -> vector<8x32xf32>
    %35 = vector.broadcast %5 : vector<1x32xf32> to vector<8x32xf32>
    %36 = arith.addf %34, %35 : vector<8x32xf32>
    %cst_20 = arith.constant dense<0.000000e+00> : vector<8x32xf32>
    %37 = tpu.matmul %29, %3, %cst_20 {dimension_numbers = #tpu.dot_dimension_numbers<[1], [0], [0], [1], [0, 0, 1, 1], [], []>} : vector<8x32xf32>, vector<32x32xf32>, vector<8x32xf32> -> vector<8x32xf32>
    %38 = arith.addf %36, %37 : vector<8x32xf32>
    %39 = math.tanh %38 : vector<8x32xf32>
    %40 = vector.extract_strided_slice %9 {offsets = [32, 0], sizes = [8, 32], strides = [1, 1]} : vector<64x32xf32> to vector<8x32xf32>
    %cst_21 = arith.constant dense<0.000000e+00> : vector<8x32xf32>
    %41 = tpu.matmul %33, %2, %cst_21 {dimension_numbers = #tpu.dot_dimension_numbers<[1], [0], [0], [1], [0, 0, 1, 1], [], []>} : vector<8x32xf32>, vector<32x32xf32>, vector<8x32xf32> -> vector<8x32xf32>
    %42 = arith.addf %40, %41 : vector<8x32xf32>
    %43 = math.tanh %42 : vector<8x32xf32>
    %cst_22 = arith.constant dense<0.000000e+00> : vector<8x32xf32>
    %44 = tpu.matmul %33, %1, %cst_22 {dimension_numbers = #tpu.dot_dimension_numbers<[1], [0], [0], [1], [0, 0, 1, 1], [], []>} : vector<8x32xf32>, vector<32x32xf32>, vector<8x32xf32> -> vector<8x32xf32>
    %45 = vector.broadcast %5 : vector<1x32xf32> to vector<8x32xf32>
    %46 = arith.addf %44, %45 : vector<8x32xf32>
    %cst_23 = arith.constant dense<0.000000e+00> : vector<8x32xf32>
    %47 = tpu.matmul %39, %3, %cst_23 {dimension_numbers = #tpu.dot_dimension_numbers<[1], [0], [0], [1], [0, 0, 1, 1], [], []>} : vector<8x32xf32>, vector<32x32xf32>, vector<8x32xf32> -> vector<8x32xf32>
    %48 = arith.addf %46, %47 : vector<8x32xf32>
    %49 = math.tanh %48 : vector<8x32xf32>
    %50 = vector.extract_strided_slice %9 {offsets = [40, 0], sizes = [8, 32], strides = [1, 1]} : vector<64x32xf32> to vector<8x32xf32>
    %cst_24 = arith.constant dense<0.000000e+00> : vector<8x32xf32>
    %51 = tpu.matmul %43, %2, %cst_24 {dimension_numbers = #tpu.dot_dimension_numbers<[1], [0], [0], [1], [0, 0, 1, 1], [], []>} : vector<8x32xf32>, vector<32x32xf32>, vector<8x32xf32> -> vector<8x32xf32>
    %52 = arith.addf %50, %51 : vector<8x32xf32>
    %53 = math.tanh %52 : vector<8x32xf32>
    %cst_25 = arith.constant dense<0.000000e+00> : vector<8x32xf32>
    %54 = tpu.matmul %43, %1, %cst_25 {dimension_numbers = #tpu.dot_dimension_numbers<[1], [0], [0], [1], [0, 0, 1, 1], [], []>} : vector<8x32xf32>, vector<32x32xf32>, vector<8x32xf32> -> vector<8x32xf32>
    %55 = vector.broadcast %5 : vector<1x32xf32> to vector<8x32xf32>
    %56 = arith.addf %54, %55 : vector<8x32xf32>
    %cst_26 = arith.constant dense<0.000000e+00> : vector<8x32xf32>
    %57 = tpu.matmul %49, %3, %cst_26 {dimension_numbers = #tpu.dot_dimension_numbers<[1], [0], [0], [1], [0, 0, 1, 1], [], []>} : vector<8x32xf32>, vector<32x32xf32>, vector<8x32xf32> -> vector<8x32xf32>
    %58 = arith.addf %56, %57 : vector<8x32xf32>
    %59 = math.tanh %58 : vector<8x32xf32>
    %60 = vector.extract_strided_slice %9 {offsets = [48, 0], sizes = [8, 32], strides = [1, 1]} : vector<64x32xf32> to vector<8x32xf32>
    %cst_27 = arith.constant dense<0.000000e+00> : vector<8x32xf32>
    %61 = tpu.matmul %53, %2, %cst_27 {dimension_numbers = #tpu.dot_dimension_numbers<[1], [0], [0], [1], [0, 0, 1, 1], [], []>} : vector<8x32xf32>, vector<32x32xf32>, vector<8x32xf32> -> vector<8x32xf32>
    %62 = arith.addf %60, %61 : vector<8x32xf32>
    %63 = math.tanh %62 : vector<8x32xf32>
    %cst_28 = arith.constant dense<0.000000e+00> : vector<8x32xf32>
    %64 = tpu.matmul %53, %1, %cst_28 {dimension_numbers = #tpu.dot_dimension_numbers<[1], [0], [0], [1], [0, 0, 1, 1], [], []>} : vector<8x32xf32>, vector<32x32xf32>, vector<8x32xf32> -> vector<8x32xf32>
    %65 = vector.broadcast %5 : vector<1x32xf32> to vector<8x32xf32>
    %66 = arith.addf %64, %65 : vector<8x32xf32>
    %cst_29 = arith.constant dense<0.000000e+00> : vector<8x32xf32>
    %67 = tpu.matmul %59, %3, %cst_29 {dimension_numbers = #tpu.dot_dimension_numbers<[1], [0], [0], [1], [0, 0, 1, 1], [], []>} : vector<8x32xf32>, vector<32x32xf32>, vector<8x32xf32> -> vector<8x32xf32>
    %68 = arith.addf %66, %67 : vector<8x32xf32>
    %69 = math.tanh %68 : vector<8x32xf32>
    %70 = vector.extract_strided_slice %9 {offsets = [56, 0], sizes = [8, 32], strides = [1, 1]} : vector<64x32xf32> to vector<8x32xf32>
    %cst_30 = arith.constant dense<0.000000e+00> : vector<8x32xf32>
    %71 = tpu.matmul %63, %2, %cst_30 {dimension_numbers = #tpu.dot_dimension_numbers<[1], [0], [0], [1], [0, 0, 1, 1], [], []>} : vector<8x32xf32>, vector<32x32xf32>, vector<8x32xf32> -> vector<8x32xf32>
    %72 = arith.addf %70, %71 : vector<8x32xf32>
    %73 = math.tanh %72 : vector<8x32xf32>
    %cst_31 = arith.constant dense<0.000000e+00> : vector<8x32xf32>
    %74 = tpu.matmul %63, %1, %cst_31 {dimension_numbers = #tpu.dot_dimension_numbers<[1], [0], [0], [1], [0, 0, 1, 1], [], []>} : vector<8x32xf32>, vector<32x32xf32>, vector<8x32xf32> -> vector<8x32xf32>
    %75 = vector.broadcast %5 : vector<1x32xf32> to vector<8x32xf32>
    %76 = arith.addf %74, %75 : vector<8x32xf32>
    %cst_32 = arith.constant dense<0.000000e+00> : vector<8x32xf32>
    %77 = tpu.matmul %69, %3, %cst_32 {dimension_numbers = #tpu.dot_dimension_numbers<[1], [0], [0], [1], [0, 0, 1, 1], [], []>} : vector<8x32xf32>, vector<32x32xf32>, vector<8x32xf32> -> vector<8x32xf32>
    %78 = arith.addf %76, %77 : vector<8x32xf32>
    %79 = math.tanh %78 : vector<8x32xf32>
    %cst_33 = arith.constant dense<0.000000e+00> : vector<8x32xf32>
    %80 = tpu.matmul %73, %1, %cst_33 {dimension_numbers = #tpu.dot_dimension_numbers<[1], [0], [0], [1], [0, 0, 1, 1], [], []>} : vector<8x32xf32>, vector<32x32xf32>, vector<8x32xf32> -> vector<8x32xf32>
    %81 = vector.broadcast %5 : vector<1x32xf32> to vector<8x32xf32>
    %82 = arith.addf %80, %81 : vector<8x32xf32>
    %cst_34 = arith.constant dense<0.000000e+00> : vector<8x32xf32>
    %83 = tpu.matmul %79, %3, %cst_34 {dimension_numbers = #tpu.dot_dimension_numbers<[1], [0], [0], [1], [0, 0, 1, 1], [], []>} : vector<8x32xf32>, vector<32x32xf32>, vector<8x32xf32> -> vector<8x32xf32>
    %84 = arith.addf %82, %83 : vector<8x32xf32>
    %85 = math.tanh %84 : vector<8x32xf32>
    %86 = tpu.concatenate %19, %29, %39, %49, %59, %69, %79, %85 in 0 : vector<8x32xf32>, vector<8x32xf32>, vector<8x32xf32>, vector<8x32xf32>, vector<8x32xf32>, vector<8x32xf32>, vector<8x32xf32>, vector<8x32xf32> -> vector<64x32xf32>
    %c0_35 = arith.constant 0 : index
    %c0_36 = arith.constant 0 : index
    %87 = vector.load %arg7[%c0_35, %c0_36] : memref<32x4xf32, #tpu.memory_space<vmem>>, vector<32x4xf32>
    %cst_37 = arith.constant dense<0.000000e+00> : vector<64x4xf32>
    %88 = tpu.matmul %86, %87, %cst_37 {dimension_numbers = #tpu.dot_dimension_numbers<[1], [0], [0], [1], [0, 0, 1, 1], [], []>} : vector<64x32xf32>, vector<32x4xf32>, vector<64x4xf32> -> vector<64x4xf32>
    %c0_38 = arith.constant 0 : index
    %c0_39 = arith.constant 0 : index
    %89 = vector.load %arg8[%c0_38, %c0_39] : memref<1x4xf32, #tpu.memory_space<vmem>>, vector<1x4xf32>
    %90 = vector.broadcast %89 : vector<1x4xf32> to vector<64x4xf32>
    %91 = arith.addf %88, %90 : vector<64x4xf32>
    %c0_40 = arith.constant 0 : index
    %c0_41 = arith.constant 0 : index
    %92 = vector.load %arg9[%c0_40, %c0_41] : memref<64x4xf32, #tpu.memory_space<vmem>>, vector<64x4xf32>
    tpu.vector_store %arg9[%c0_40, %c0_41], %91 {strides = array<i32>} : memref<64x4xf32, #tpu.memory_space<vmem>>, vector<64x4xf32>,
    return
  }
}

</mosaic_0001>

<bundles_post_ra>
// kernel: tpu_custom_call.1
= control target key start
LH: loop header
LB: loop body
LE: loop exit
PB: predicated region body
PF: predicated region fallthrough
CT: control target
= control target key end

     0   :  { %vm83_vm0 = vcmask 1043456   ;;  %vm58_vm1 = vcmask 31744   ;;  %vm129_vm2 = vcmask 261120   ;;  %s1175_s1 = inlined_call_operand.vmem [shape: f32[4,32], index: 1, kind: input, shape index: {}]   ;;  %s1176_s0 = inlined_call_operand.vmem [shape: f32[64,4], index: 0, kind: input, shape index: {}]   ;;  %s1177_s3 = inlined_call_operand.vmem [shape: f32[1,32], index: 3, kind: input, shape index: {}]   ;;  %s1178_s2 = inlined_call_operand.vmem [shape: f32[32,32], index: 2, kind: input, shape index: {}]   ;;  %s1179_s4 = inlined_call_operand.vmem [shape: f32[32,32], index: 4, kind: input, shape index: {}]   ;;  %s1180_s6 = inlined_call_operand.vmem [shape: f32[1,32], index: 6, kind: input, shape index: {}]   ;;  %s1181_s5 = inlined_call_operand.vmem [shape: f32[32,32], index: 5, kind: input, shape index: {}]   ;;  %s1182_s7 = inlined_call_operand.vmem [shape: f32[32,4], index: 7, kind: input, shape index: {}]   ;;  %s1183_s8 = inlined_call_operand.vmem [shape: f32[1,4], index: 8, kind: input, shape index: {}]   ;;  %s1184_s9 = inlined_call_operand.vmem [shape: f32[64,4], index: 9, kind: output, shape index: {}]  }
   0x1   :  { %v32_v0 = vld [vmem:[%s1175_s1] sm:$0xf]  ;;  %v853_v2 = vld [vmem:[%s1178_s2 + $0x18] sm:$0xff]  ;;  %v859_v3 = vld [vmem:[%s1178_s2 + $0x10] sm:$0xff] }
   0x2   :  { %v47_v1 = vld [vmem:[%s1176_s0] sm:$0xff]  ;;  %711 = vmatpush.msk.msra.mxu0 %vm83_vm0, %v32_v0  ;;  %145 = vmatpush.msra.mxu1 %v853_v2  ;;  %v48_v4 = vld [vmem:[%s1176_s0 + $0x8] sm:$0xff]  ;;  %v885_v7 = vld [vmem:[%s1179_s4 + $0x18] sm:$0xff] }
   0x3   :  { %712 = vmatmul.msk.f32.vlgmr.msra.gmra.mxu0 %vm58_vm1, %v47_v1  ;;  %194 = vmatpush.msra.mxu3 %v853_v2  ;;  %v868_v5 = vld [vmem:[%s1178_s2 + $0x8] sm:$0xff]  ;;  %v876_v6 = vld [vmem:[%s1178_s2] sm:$0xff]  ;;  %v890_v8 = vld [vmem:[%s1179_s4 + $0x10] sm:$0xff] }
   0x4   :  { %146 = vmatpush.msra.mxu1 %v859_v3  ;;  %v897_v9 = vld [vmem:[%s1179_s4 + $0x8] sm:$0xff]  ;;  %v904_v10 = vld [vmem:[%s1179_s4] sm:$0xff]  ;;  %v49_v11 = vld [vmem:[%s1176_s0 + $0x10] sm:$0xff] }
   0x5   :  { %195 = vmatpush.msra.mxu3 %v859_v3  ;;  %v50_v12 = vld [vmem:[%s1176_s0 + $0x18] sm:$0xff]  ;;  %v921_v13 = vld [vmem:[%s1177_s3] ss:$0 sm:$0xff]  ;;  %v52_v17 = vld [vmem:[%s1176_s0 + $0x28] sm:$0xff] }
   0x6   :  { %147 = vmatpush.msra.mxu1 %v868_v5  ;;  %v51_v15 = vld [vmem:[%s1176_s0 + $0x20] sm:$0xff]  ;;  %v53_v19 = vld [vmem:[%s1176_s0 + $0x30] sm:$0xff]  ;;  %v54_v20 = vld [vmem:[%s1176_s0 + $0x38] sm:$0xff] }
   0x7   :  { %196 = vmatpush.msra.mxu3 %v868_v5  ;;  %v953_v21 = vld [vmem:[%s1181_s5 + $0x18] sm:$0xff]  ;;  %v965_v23 = vld [vmem:[%s1181_s5 + $0x10] sm:$0xff]  ;;  %v975_v25 = vld [vmem:[%s1181_s5 + $0x8] sm:$0xff] }
   0x8   :  { %148 = vmatpush.msra.mxu1 %v876_v6  ;;  %v958_v22 = vld [vmem:[%s1182_s7 + $0x18] sm:$0xff]  ;;  %239 = vmatpush.msra.mxu2 %v953_v21  ;;  %v970_v24 = vld [vmem:[%s1182_s7 + $0x10] sm:$0xff]  ;;  %v980_v26 = vld [vmem:[%s1182_s7 + $0x8] sm:$0xff] }
   0x9   :  { %197 = vmatpush.msra.mxu3 %v876_v6  ;;  %670 = vmatpush.msrb.mxu0 %v958_v22  ;;  %v987_v27 = vld [vmem:[%s1181_s5] sm:$0xff] }
   0xa   :  { %170 = vmatpush.msrb.mxu1 %v885_v7  ;;  %240 = vmatpush.msra.mxu2 %v965_v23  ;;  %v992_v28 = vld [vmem:[%s1182_s7] sm:$0xff] }
   0xb   :  { %713 = vmatmul.msk.f32.gmra.mxu0 %vm58_vm1, %v48_v4  ;;  %264 = vmatpush.msrb.mxu3 %v853_v2  ;;  %v1006_v33 = vld [vmem:[%s1180_s6] ss:$0 sm:$0xff] }
   0xc   :  { %171 = vmatpush.msrb.mxu1 %v890_v8  ;;  %671 = vmatpush.msrb.mxu0 %v970_v24  ;;  %v1037_v45 = vld [vmem:[%s1183_s8] ss:$0 sm:$0xff] }
   0xd   :  { %265 = vmatpush.msrb.mxu3 %v859_v3  ;;  %241 = vmatpush.msra.mxu2 %v975_v25 }
   0xe   :  { %172 = vmatpush.msrb.mxu1 %v897_v9  ;;  %672 = vmatpush.msrb.mxu0 %v980_v26 }
   0xf   :  { %266 = vmatpush.msrb.mxu3 %v868_v5  ;;  %242 = vmatpush.msra.mxu2 %v987_v27 }
  0x10   :  { %173 = vmatpush.msrb.mxu1 %v904_v10  ;;  %673 = vmatpush.msrb.mxu0 %v992_v28 }
  0x11   :  { %267 = vmatpush.msrb.mxu3 %v876_v6  ;;  %309 = vmatpush.msrb.mxu2 %v953_v21 }
  0x13   :  { %714 = vmatmul.msk.f32.gmra.mxu0 %vm58_vm1, %v49_v11  ;;  %310 = vmatpush.msrb.mxu2 %v965_v23 }
  0x15   :  { %311 = vmatpush.msrb.mxu2 %v975_v25 }
  0x17   :  { %312 = vmatpush.msrb.mxu2 %v987_v27 }
  0x1b   :  { %715 = vmatmul.msk.f32.gmra.mxu0 %vm58_vm1, %v50_v12 }
  0x23   :  { %716 = vmatmul.msk.f32.gmra.mxu0 %vm58_vm1, %v51_v15 }
  0x2b   :  { %717 = vmatmul.msk.f32.gmra.mxu0 %vm58_vm1, %v52_v17 }
  0x33   :  { %718 = vmatmul.msk.f32.gmra.mxu0 %vm58_vm1, %v53_v19 }
  0x3b   :  { %719 = vmatmul.msk.f32.gmra.mxu0 %vm58_vm1, %v54_v20 }
  0x80   :  { %v104_v14 = vpop.f32.mrf.mxu0 }
  0x81   :  { %v105_v16 = vadd.f32 %v921_v13, %v104_v14 }
  0x83   :  { %761 = vtanh.f32 %v105_v16 }
  0x88   :  { %v107_v29 = vpop.f32.mrf.mxu0 }
  0x89   :  { %v762_v18 = vpop.eup %761  ;;  %v108_v30 = vadd.f32 %v921_v13, %v107_v29 }
  0x8a   :  { %720 = vmatmul.msk.f32.vlgmr.msra.gmra.mxu1 %vm129_vm2, %v762_v18 }
  0x8b   :  { %216 = vmatpush.msra.mxu1 %v885_v7 }
  0x8d   :  { %217 = vmatpush.msra.mxu1 %v890_v8 }
  0x8f   :  { %218 = vmatpush.msra.mxu1 %v897_v9 }
  0x90   :  { %v110_v38 = vpop.f32.mrf.mxu0 }
  0x91   :  { %219 = vmatpush.msra.mxu1 %v904_v10  ;;  %v111_v44 = vadd.f32 %v921_v13, %v110_v38 }
  0x92   :  { %721 = vmatmul.msk.f32.vlgmr.msrb.gmra.mxu1 %vm129_vm2, %v762_v18 }
  0x93   :  { %286 = vmatpush.msrb.mxu1 %v885_v7 }
  0x95   :  { %287 = vmatpush.msrb.mxu1 %v890_v8 }
  0x97   :  { %288 = vmatpush.msrb.mxu1 %v897_v9 }
  0x98   :  { %v113_v39 = vpop.f32.mrf.mxu0 }
  0x99   :  { %289 = vmatpush.msrb.mxu1 %v904_v10  ;;  %v114_v56 = vadd.f32 %v921_v13, %v113_v39 }
  0xa0   :  { %v1025_v40 = vpop.f32.mrf.mxu0 }
  0xa1   :  { %v117_v11 = vadd.f32 %v921_v13, %v1025_v40 }
  0xa8   :  { %v1027_v41 = vpop.f32.mrf.mxu0 }
  0xb0   :  { %v1029_v42 = vpop.f32.mrf.mxu0 }
  0xb8   :  { %v1031_v43 = vpop.f32.mrf.mxu0 }
 0x107   :  { %v150_v31 = vpop.f32.mrf.mxu1 }
 0x108   :  { %v153_v32 = vadd.f32 %v150_v31, %v108_v30 }
 0x10a   :  { %763 = vtanh.f32 %v153_v32 }
 0x10f   :  { %v175_v34 = vpop.f32.mrf.mxu1 }
 0x110   :  { %v764_v35 = vpop.eup %763  ;;  %v176_v36 = vadd.f32 %v1006_v33, %v175_v34 }
 0x111   :  { %722 = vmatmul.msk.f32.vlgmr.msra.gmra.mxu3 %vm129_vm2, %v764_v35  ;;  %723 = vmatmul.msk.f32.vlgmr.msra.gmra.mxu1 %vm129_vm2, %v764_v35 }
 0x112   :  { %765 = vtanh.f32 %v176_v36  ;;  %334 = vmatpush.msra.mxu3 %v853_v2  ;;  %356 = vmatpush.msra.mxu1 %v885_v7  ;;  %v126_v36 = vadd.f32 %v921_v13, %v1031_v43 }
 0x114   :  { %335 = vmatpush.msra.mxu3 %v859_v3  ;;  %357 = vmatpush.msra.mxu1 %v890_v8 }
 0x116   :  { %336 = vmatpush.msra.mxu3 %v868_v5  ;;  %358 = vmatpush.msra.mxu1 %v897_v9 }
 0x118   :  { %v766_v37 = vpop.eup %765  ;;  %337 = vmatpush.msra.mxu3 %v876_v6  ;;  %359 = vmatpush.msra.mxu1 %v904_v10 }
 0x119   :  { %724 = vmatmul.msk.f32.vlgmr.msra.gmra.mxu2 %vm129_vm2, %v766_v37  ;;  %742 = vmatmul.msk.f32.vlgmr.msrb.gmra.mxu0 %vm129_vm2, %v766_v37 }
 0x11a   :  { %379 = vmatpush.msra.mxu2 %v953_v21 }
 0x11c   :  { %380 = vmatpush.msra.mxu2 %v965_v23 }
 0x11e   :  { %381 = vmatpush.msra.mxu2 %v975_v25 }
 0x120   :  { %382 = vmatpush.msra.mxu2 %v987_v27 }
 0x18e   :  { %v221_v50 = vpop.f32.mrf.mxu1 }
 0x18f   :  { %v222_v51 = vadd.f32 %v1006_v33, %v221_v50 }
 0x194   :  { %v199_v46 = vpop.f32.mrf.mxu3 }
 0x195   :  { %v202_v47 = vadd.f32 %v199_v46, %v111_v44 }
 0x196   :  { %v675_v48 = vpop.f32.mrf.mxu0 }
 0x197   :  { %767 = vtanh.f32 %v202_v47  ;;  %v676_v49 = vadd.f32 %v1037_v45, %v675_v48 }
 0x199   :  { %699 = vst.msk [vmem:[%s1184_s9] sm:$0xff] %vm58_vm1, %v676_v49 }
 0x19c   :  { %v244_v52 = vpop.f32.mrf.mxu2 }
 0x19d   :  { %v768_v53 = vpop.eup %767  ;;  %v247_v54 = vadd.f32 %v244_v52, %v222_v51 }
 0x19e   :  { %725 = vmatmul.msk.f32.vlgmr.msrb.gmra.mxu3 %vm129_vm2, %v768_v53  ;;  %726 = vmatmul.msk.f32.vlgmr.msrb.gmra.mxu1 %vm129_vm2, %v768_v53 }
 0x19f   :  { %769 = vtanh.f32 %v247_v54  ;;  %404 = vmatpush.msrb.mxu3 %v853_v2  ;;  %426 = vmatpush.msrb.mxu1 %v885_v7 }
 0x1a1   :  { %405 = vmatpush.msrb.mxu3 %v859_v3  ;;  %427 = vmatpush.msrb.mxu1 %v890_v8 }
 0x1a3   :  { %406 = vmatpush.msrb.mxu3 %v868_v5  ;;  %428 = vmatpush.msrb.mxu1 %v897_v9 }
 0x1a5   :  { %v770_v55 = vpop.eup %769  ;;  %407 = vmatpush.msrb.mxu3 %v876_v6  ;;  %429 = vmatpush.msrb.mxu1 %v904_v10 }
 0x1a6   :  { %727 = vmatmul.msk.f32.vlgmr.msrb.gmra.mxu2 %vm129_vm2, %v770_v55  ;;  %743 = vmatmul.msk.f32.gmra.mxu0 %vm129_vm2, %v770_v55 }
 0x1a7   :  { %449 = vmatpush.msrb.mxu2 %v953_v21 }
 0x1a9   :  { %450 = vmatpush.msrb.mxu2 %v965_v23 }
 0x1ab   :  { %451 = vmatpush.msrb.mxu2 %v975_v25 }
 0x1ad   :  { %452 = vmatpush.msrb.mxu2 %v987_v27 }
 0x21b   :  { %v291_v61 = vpop.f32.mrf.mxu1 }
 0x21c   :  { %v292_v62 = vadd.f32 %v1006_v33, %v291_v61 }
 0x221   :  { %v269_v57 = vpop.f32.mrf.mxu3 }
 0x222   :  { %v272_v58 = vadd.f32 %v269_v57, %v114_v56 }
 0x223   :  { %v678_v59 = vpop.f32.mrf.mxu0 }
 0x224   :  { %771 = vtanh.f32 %v272_v58  ;;  %v679_v60 = vadd.f32 %v1037_v45, %v678_v59 }
 0x226   :  { %700 = vst.msk [vmem:[%s1184_s9 + $0x8] sm:$0xff] %vm58_vm1, %v679_v60 }
 0x229   :  { %v314_v63 = vpop.f32.mrf.mxu2 }
 0x22a   :  { %v772_v0 = vpop.eup %771  ;;  %v317_v1 = vadd.f32 %v314_v63, %v292_v62 }
 0x22b   :  { %728 = vmatmul.msk.f32.vlgmr.msra.gmra.mxu3 %vm129_vm2, %v772_v0  ;;  %729 = vmatmul.msk.f32.vlgmr.msra.gmra.mxu1 %vm129_vm2, %v772_v0 }
 0x22c   :  { %773 = vtanh.f32 %v317_v1  ;;  %474 = vmatpush.msra.mxu3 %v853_v2  ;;  %496 = vmatpush.msra.mxu1 %v885_v7 }
 0x22e   :  { %475 = vmatpush.msra.mxu3 %v859_v3  ;;  %497 = vmatpush.msra.mxu1 %v890_v8 }
 0x230   :  { %476 = vmatpush.msra.mxu3 %v868_v5  ;;  %498 = vmatpush.msra.mxu1 %v897_v9 }
 0x232   :  { %v1076_v4 = vpop.eup %773  ;;  %477 = vmatpush.msra.mxu3 %v876_v6  ;;  %499 = vmatpush.msra.mxu1 %v904_v10 }
 0x233   :  { %730 = vmatmul.msk.f32.vlgmr.msra.gmra.mxu2 %vm129_vm2, %v1076_v4 }
 0x234   :  { %519 = vmatpush.msra.mxu2 %v953_v21 }
 0x236   :  { %520 = vmatpush.msra.mxu2 %v965_v23 }
 0x238   :  { %521 = vmatpush.msra.mxu2 %v975_v25 }
 0x23a   :  { %522 = vmatpush.msra.mxu2 %v987_v27 }
 0x2a8   :  { %v361_v15 = vpop.f32.mrf.mxu1 }
 0x2a9   :  { %v362_v16 = vadd.f32 %v1006_v33, %v361_v15 }
 0x2ae   :  { %v339_v12 = vpop.f32.mrf.mxu3 }
 0x2af   :  { %v342_v14 = vadd.f32 %v339_v12, %v117_v11 }
 0x2b1   :  { %775 = vtanh.f32 %v342_v14 }
 0x2b6   :  { %v384_v17 = vpop.f32.mrf.mxu2 }
 0x2b7   :  { %v776_v18 = vpop.eup %775  ;;  %v387_v19 = vadd.f32 %v384_v17, %v362_v16 }
 0x2b8   :  { %731 = vmatmul.msk.f32.vlgmr.msrb.gmra.mxu3 %vm129_vm2, %v776_v18  ;;  %732 = vmatmul.msk.f32.vlgmr.msrb.gmra.mxu1 %vm129_vm2, %v776_v18 }
 0x2b9   :  { %777 = vtanh.f32 %v387_v19  ;;  %544 = vmatpush.msrb.mxu3 %v853_v2  ;;  %566 = vmatpush.msrb.mxu1 %v885_v7  ;;  %v120_v2 = vadd.f32 %v921_v13, %v1027_v41 }
 0x2bb   :  { %545 = vmatpush.msrb.mxu3 %v859_v3  ;;  %567 = vmatpush.msrb.mxu1 %v890_v8 }
 0x2bd   :  { %546 = vmatpush.msrb.mxu3 %v868_v5  ;;  %568 = vmatpush.msrb.mxu1 %v897_v9 }
 0x2bf   :  { %v778_v20 = vpop.eup %777  ;;  %547 = vmatpush.msrb.mxu3 %v876_v6  ;;  %569 = vmatpush.msrb.mxu1 %v904_v10 }
 0x2c0   :  { %733 = vmatmul.msk.f32.vlgmr.msrb.gmra.mxu2 %vm129_vm2, %v778_v20 }
 0x2c1   :  { %589 = vmatpush.msrb.mxu2 %v953_v21 }
 0x2c3   :  { %590 = vmatpush.msrb.mxu2 %v965_v23 }
 0x2c5   :  { %591 = vmatpush.msrb.mxu2 %v975_v25 }
 0x2c7   :  { %592 = vmatpush.msrb.mxu2 %v987_v27 }
 0x335   :  { %v431_v29 = vpop.f32.mrf.mxu1 }
 0x336   :  { %v432_v6 = vadd.f32 %v1006_v33, %v431_v29 }
 0x33b   :  { %v409_v3 = vpop.f32.mrf.mxu3 }
 0x33c   :  { %v412_v5 = vadd.f32 %v409_v3, %v120_v2 }
 0x33e   :  { %779 = vtanh.f32 %v412_v5 }
 0x343   :  { %v454_v30 = vpop.f32.mrf.mxu2 }
 0x344   :  { %v780_v31 = vpop.eup %779  ;;  %v457_v32 = vadd.f32 %v454_v30, %v432_v6 }
 0x345   :  { %734 = vmatmul.msk.f32.vlgmr.msra.gmra.mxu3 %vm129_vm2, %v780_v31  ;;  %735 = vmatmul.msk.f32.vlgmr.msra.gmra.mxu1 %vm129_vm2, %v780_v31 }
 0x346   :  { %781 = vtanh.f32 %v457_v32  ;;  %614 = vmatpush.msra.mxu3 %v885_v7  ;;  %637 = vmatpush.msra.mxu1 %v953_v21  ;;  %v123_v7 = vadd.f32 %v921_v13, %v1029_v42 }
 0x348   :  { %615 = vmatpush.msra.mxu3 %v890_v8  ;;  %638 = vmatpush.msra.mxu1 %v965_v23 }
 0x34a   :  { %616 = vmatpush.msra.mxu3 %v897_v9  ;;  %639 = vmatpush.msra.mxu1 %v975_v25 }
 0x34c   :  { %v782_v34 = vpop.eup %781  ;;  %617 = vmatpush.msra.mxu3 %v904_v10  ;;  %640 = vmatpush.msra.mxu1 %v987_v27 }
 0x34d   :  { %736 = vmatmul.msk.f32.vlgmr.msra.gmra.mxu2 %vm129_vm2, %v782_v34 }
 0x34e   :  { %750 = vmatpush.msra.mxu2 %v958_v22 }
 0x350   :  { %752 = vmatpush.msra.mxu2 %v970_v24 }
 0x352   :  { %754 = vmatpush.msra.mxu2 %v980_v26 }
 0x354   :  { %756 = vmatpush.msra.mxu2 %v992_v28 }
 0x3c2   :  { %v501_v21 = vpop.f32.mrf.mxu1 }
 0x3c3   :  { %v502_v10 = vadd.f32 %v1006_v33, %v501_v21 }
 0x3c8   :  { %v479_v8 = vpop.f32.mrf.mxu3 }
 0x3c9   :  { %v482_v9 = vadd.f32 %v479_v8, %v123_v7 }
 0x3cb   :  { %783 = vtanh.f32 %v482_v9 }
 0x3d0   :  { %v524_v23 = vpop.f32.mrf.mxu2 }
 0x3d1   :  { %v784_v25 = vpop.eup %783  ;;  %v527_v27 = vadd.f32 %v524_v23, %v502_v10 }
 0x3d2   :  { %737 = vmatmul.msk.f32.vlgmr.msrb.gmra.mxu3 %vm129_vm2, %v784_v25  ;;  %738 = vmatmul.msk.f32.vlgmr.msrb.gmra.mxu1 %vm129_vm2, %v784_v25 }
 0x3d3   :  { %785 = vtanh.f32 %v527_v27  ;;  %751 = vmatpush.msrb.mxu3 %v958_v22 }
 0x3d5   :  { %753 = vmatpush.msrb.mxu3 %v970_v24 }
 0x3d7   :  { %755 = vmatpush.msrb.mxu3 %v980_v26 }
 0x3d9   :  { %v786_v35 = vpop.eup %785  ;;  %757 = vmatpush.msrb.mxu3 %v992_v28 }
 0x3da   :  { %739 = vmatmul.msk.f32.vlgmr.msrb.gmra.mxu2 %vm129_vm2, %v786_v35 }
 0x3e2   :  { %744 = vmatmul.msk.f32.vlgmr.msra.gmra.mxu2 %vm129_vm2, %v1076_v4 }
 0x3ea   :  { %745 = vmatmul.msk.f32.gmra.mxu2 %vm129_vm2, %v778_v20 }
 0x3f2   :  { %746 = vmatmul.msk.f32.gmra.mxu2 %vm129_vm2, %v782_v34 }
 0x44f   :  { %v571_v24 = vpop.f32.mrf.mxu1 }
 0x450   :  { %v572_v26 = vadd.f32 %v1006_v33, %v571_v24 }
 0x455   :  { %v549_v22 = vpop.f32.mrf.mxu3 }
 0x456   :  { %v552_v37 = vadd.f32 %v549_v22, %v126_v36 }
 0x458   :  { %787 = vtanh.f32 %v552_v37 }
 0x45d   :  { %v594_v38 = vpop.f32.mrf.mxu2 }
 0x45e   :  { %v788_v28 = vpop.eup %787  ;;  %v597_v39 = vadd.f32 %v594_v38, %v572_v26 }
 0x45f   :  { %740 = vmatmul.msk.f32.vlgmr.msra.gmra.mxu3 %vm129_vm2, %v788_v28 }
 0x460   :  { %789 = vtanh.f32 %v597_v39 }
 0x465   :  { %v681_v40 = vpop.f32.mrf.mxu2 }
 0x466   :  { %v790_v41 = vpop.eup %789  ;;  %v682_v42 = vadd.f32 %v1037_v45, %v681_v40 }
 0x467   :  { %741 = vmatmul.msk.f32.vlgmr.msra.gmra.mxu1 %vm129_vm2, %v790_v41  ;;  %747 = vmatmul.msk.f32.vlgmr.msrb.gmra.mxu3 %vm129_vm2, %v786_v35 }
 0x468   :  { %701 = vst.msk [vmem:[%s1184_s9 + $0x10] sm:$0xff] %vm58_vm1, %v682_v42 }
 0x46d   :  { %v684_v13 = vpop.f32.mrf.mxu2 }
 0x46e   :  { %v685_v43 = vadd.f32 %v1037_v45, %v684_v13 }
 0x46f   :  { %748 = vmatmul.msk.f32.gmra.mxu3 %vm129_vm2, %v790_v41 }
 0x470   :  { %702 = vst.msk [vmem:[%s1184_s9 + $0x18] sm:$0xff] %vm58_vm1, %v685_v43 }
 0x475   :  { %v687_v44 = vpop.f32.mrf.mxu2 }
 0x476   :  { %v688_v46 = vadd.f32 %v1037_v45, %v687_v44 }
 0x478   :  { %703 = vst.msk [vmem:[%s1184_s9 + $0x20] sm:$0xff] %vm58_vm1, %v688_v46 }
 0x4e2   :  { %v619_v47 = vpop.f32.mrf.mxu3 }
 0x4e3   :  { %v620_v48 = vadd.f32 %v1006_v33, %v619_v47 }
 0x4e4   :  { %v642_v49 = vpop.f32.mrf.mxu1 }
 0x4e5   :  { %v645_v50 = vadd.f32 %v642_v49, %v620_v48 }
 0x4e7   :  { %791 = vtanh.f32 %v645_v50 }
 0x4ea   :  { %v690_v51 = vpop.f32.mrf.mxu3 }
 0x4eb   :  { %v691_v52 = vadd.f32 %v1037_v45, %v690_v51 }
 0x4ed   :  { %v792_v53 = vpop.eup %791  ;;  %704 = vst.msk [vmem:[%s1184_s9 + $0x28] sm:$0xff] %vm58_vm1, %v691_v52 }
 0x4ee   :  { %749 = vmatmul.msk.f32.gmra.mxu3 %vm129_vm2, %v792_v53 }
 0x4f2   :  { %v693_v54 = vpop.f32.mrf.mxu3 }
 0x4f3   :  { %v694_v55 = vadd.f32 %v1037_v45, %v693_v54 }
 0x4f5   :  { %705 = vst.msk [vmem:[%s1184_s9 + $0x30] sm:$0xff] %vm58_vm1, %v694_v55 }
 0x571   :  { %v696_v33 = vpop.f32.mrf.mxu3 }
 0x572   :  { %v697_v56 = vadd.f32 %v1037_v45, %v696_v33 }
 0x574   :  { %706 = vst.msk [vmem:[%s1184_s9 + $0x38] sm:$0xff] %vm58_vm1, %v697_v56 }

</bundles_post_ra>
